<compile_context>
chip_gen: v5e
topology: v5e:2x2
jax: 0.10.0
libtpu: 0.0.40
codegen_flags: <defaults>
</compile_context>

<pallas_src>
import functools

import jax
import jax.numpy as jnp
from jax import lax
from jax.experimental import pallas as pl
from jax.experimental.pallas import tpu as pltpu

LANE = 128          # last-dim (lane) padding target


def _round_up(n, m):
    return (n + m - 1) // m * m


def _cdiv(a, b):
    return (a + b - 1) // b


def _pad2d(a, rows, cols, dtype):
    r, c = a.shape
    return jnp.pad(a, ((0, rows - r), (0, cols - c))).astype(dtype)


def _sublane_for(dtype):
    """Second-to-last-dim padding target (rows per vreg) for a given dtype."""
    itemsize = jnp.dtype(dtype).itemsize
    return max(8, 32 // itemsize)          # f32 -> 8, bf16 -> 16, int8/fp8 -> 32


@functools.lru_cache(maxsize=None)
def _hw_config():
    """Generation-specific VMEM limit and batch-tiling knobs."""
    cap = None
    try:
        info = pltpu.get_tpu_info()
        for name in ("vmem_capacity_bytes", "vmem_size_bytes", "vmem_bytes"):
            cap = getattr(info, name, None)
            if cap:
                break
    except Exception:
        cap = None
    if not cap:
        # Unknown chip: conservative defaults that fit every generation.
        return {"vmem_limit": 32 * 1024 * 1024, "max_tm": 256, "min_tiles": 1}
    if cap >= 100 * 1024 * 1024:
        # v5e / v6e: 128 MiB physical VMEM, single TensorCore.
        return {"vmem_limit": 100 * 1024 * 1024, "max_tm": 512, "min_tiles": 1}
    # v7x-class: 64 MiB physical VMEM, 2 TensorCores -> keep both busy on big batches.
    return {"vmem_limit": max(32 * 1024 * 1024, cap - 16 * 1024 * 1024),
            "max_tm": 256, "min_tiles": 2}


def _choose_batch_tiling(B, sublane):
    """Returns (tm, n_tiles, b_pad) with minimal padding waste."""
    hw = _hw_config()
    if B <= LANE:
        tm = _round_up(B, sublane)
        return tm, 1, tm
    n_tiles = max(hw["min_tiles"], _cdiv(B, hw["max_tm"]))
    tm = _round_up(_cdiv(B, n_tiles), sublane)
    return tm, n_tiles, tm * n_tiles


# ----------------------------------------------------------------------------
# Kernel
# ----------------------------------------------------------------------------
def _make_mlp_kernel(*, n_hidden, has_hidden, use_scratch, unroll_hidden):
    """Builds the fused-MLP kernel for a given layer count / scratch strategy."""

    def kernel(*refs):
        x_ref, w_in_ref, b_in_ref = refs[0], refs[1], refs[2]
        pos = 3
        if has_hidden:
            w_hid_ref, b_hid_ref = refs[pos], refs[pos + 1]
            pos += 2
        w_out_ref, b_out_ref, o_ref = refs[pos], refs[pos + 1], refs[pos + 2]
        pos += 3
        h_ref = refs[pos] if use_scratch else None

        act_dtype = w_in_ref.dtype  # MXU operand / resident-activation dtype

        # ---- input layer: ReLU(x @ W_in + b_in), f32 MXU accumulation ----
        acc = jnp.dot(x_ref[...], w_in_ref[...], preferred_element_type=jnp.float32)
        h = jnp.maximum(acc + b_in_ref[...], 0.0).astype(act_dtype)

        if use_scratch:
            # Large tiles: keep the activation resident in VMEM scratch.
            h_ref[...] = h
            if has_hidden:
                if unroll_hidden:
                    for l in range(n_hidden):
                        acc = jnp.dot(h_ref[...], w_hid_ref[l],
                                      preferred_element_type=jnp.float32)
                        h_ref[...] = jnp.maximum(acc + b_hid_ref[l], 0.0).astype(act_dtype)
                else:
                    def body(l, carry):
                        acc = jnp.dot(h_ref[...], w_hid_ref[l],
                                      preferred_element_type=jnp.float32)
                        h_ref[...] = jnp.maximum(acc + b_hid_ref[l], 0.0).astype(act_dtype)
                        return carry
                    lax.fori_loop(0, n_hidden, body, 0)
            acc = jnp.dot(h_ref[...], w_out_ref[...], preferred_element_type=jnp.float32)
        else:
            # Small tiles: chain the activation as a value (no vst/vld round-trip).
            if has_hidden:
                def layer(l, h):
                    acc = jnp.dot(h, w_hid_ref[l], preferred_element_type=jnp.float32)
                    return jnp.maximum(acc + b_hid_ref[l], 0.0).astype(act_dtype)
                if unroll_hidden:
                    for l in range(n_hidden):
                        h = layer(l, h)
                else:
                    h = lax.fori_loop(0, n_hidden, layer, h)
            acc = jnp.dot(h, w_out_ref[...], preferred_element_type=jnp.float32)

        # ---- output layer epilogue (no activation), single lane-dense store ----
        o_ref[...] = (acc + b_out_ref[...]).astype(o_ref.dtype)

    return kernel


# ----------------------------------------------------------------------------
# Parameter prep (hoisted out of the forward path) and forward wrapper
# ----------------------------------------------------------------------------
def prepare_mlp_params(params, *, compute_dtype=jnp.float32, feature_lane_multiple=LANE):
    """Pad / stack / cast the weights once.

    params: list of (w, b) with w: [fan_in, fan_out], b: [1, fan_out].
    compute_dtype: MXU operand dtype (f32 = exact parity; bf16 = 2x MXU / half DMA).
    feature_lane_multiple: 128 (always legal); 256 can help on v6e/v7x when the
                           natural feature dims are already >= ~192 (256x256 MXU).
    """
    assert len(params) >= 2, "need at least input and output layers"
    In, H = params[0][0].shape
    Out = params[-1][0].shape[1]
    n_hidden = len(params) - 2

    in_p = _round_up(In, feature_lane_multiple)
    h_p = _round_up(H, feature_lane_multiple)
    out_p = _round_up(Out, feature_lane_multiple)

    prepped = {
        "in_features": In, "hidden_features": H, "out_features": Out,
        "n_hidden": n_hidden, "in_p": in_p, "h_p": h_p, "out_p": out_p,
        "compute_dtype": jnp.dtype(compute_dtype),
        "w_in": _pad2d(params[0][0], in_p, h_p, compute_dtype),
        "b_in": _pad2d(params[0][1], 1, h_p, jnp.float32),
        "w_out": _pad2d(params[-1][0], h_p, out_p, compute_dtype),
        "b_out": _pad2d(params[-1][1], 1, out_p, jnp.float32),
        "w_hid": None, "b_hid": None,
    }
    if n_hidden > 0:
        prepped["w_hid"] = jnp.stack(
            [_pad2d(w, h_p, h_p, compute_dtype) for (w, _) in params[1:-1]])
        prepped["b_hid"] = jnp.stack(
            [_pad2d(b, 1, h_p, jnp.float32) for (_, b) in params[1:-1]])
    return prepped


_BUFFERED_WEIGHTS_OK = None  # lazily discovered: does this JAX accept pl.Buffered(1)?


def mlp_forward_fused(x, prepped):
    """Fused MLP forward: one pallas_call for the whole network."""
    global _BUFFERED_WEIGHTS_OK

    B = x.shape[0]
    In, Out = prepped["in_features"], prepped["out_features"]
    in_p, h_p, out_p = prepped["in_p"], prepped["h_p"], prepped["out_p"]
    n_hidden = prepped["n_hidden"]
    cdt = prepped["compute_dtype"]
    has_hidden = n_hidden > 0

    hw = _hw_config()
    sublane = _sublane_for(cdt)
    tm, grid_b, b_pad = _choose_batch_tiling(B, sublane)

    # Only the activations are padded per call; weights are already prepped.
    x_p = _pad2d(x, b_pad, in_p, cdt)

    act_bytes = tm * h_p * jnp.dtype(cdt).itemsize
    use_scratch = act_bytes > 128 * 1024        # ~32 vregs: above this, keep h in VMEM scratch
    unroll_hidden = n_hidden <= 4               # deep stacks use fori_loop (bounded code size)

    kernel = _make_mlp_kernel(n_hidden=n_hidden, has_hidden=has_hidden,
                              use_scratch=use_scratch, unroll_hidden=unroll_hidden)

    def build_specs(buffered):
        wkw = {"pipeline_mode": pl.Buffered(1)} if buffered else {}
        in_specs = [
            pl.BlockSpec((tm, in_p), lambda i: (i, 0)),                     # x batch tile
            pl.BlockSpec((in_p, h_p), lambda i: (0, 0), **wkw),             # W_in (VMEM-resident)
            pl.BlockSpec((1, h_p), lambda i: (0, 0), **wkw),                # b_in
        ]
        operands = [x_p, prepped["w_in"], prepped["b_in"]]
        if has_hidden:
            n_stack = prepped["w_hid"].shape[0]
            in_specs += [
                pl.BlockSpec((n_stack, h_p, h_p), lambda i: (0, 0, 0), **wkw),  # stacked hidden W
                pl.BlockSpec((n_stack, 1, h_p), lambda i: (0, 0, 0), **wkw),    # stacked hidden b
            ]
            operands += [prepped["w_hid"], prepped["b_hid"]]
        in_specs += [
            pl.BlockSpec((h_p, out_p), lambda i: (0, 0), **wkw),            # W_out
            pl.BlockSpec((1, out_p), lambda i: (0, 0), **wkw),              # b_out
        ]
        operands += [prepped["w_out"], prepped["b_out"]]
        return in_specs, operands

    scratch_shapes = [pltpu.VMEM((tm, h_p), cdt)] if use_scratch else []

    if _BUFFERED_WEIGHTS_OK is None:
        attempts = [True, False]
    else:
        attempts = [_BUFFERED_WEIGHTS_OK]

    last_err = None
    for buffered in attempts:
        try:
            in_specs, operands = build_specs(buffered)
            out_padded = pl.pallas_call(
                kernel,
                out_shape=jax.ShapeDtypeStruct((b_pad, out_p), jnp.float32),
                grid_spec=pltpu.PrefetchScalarGridSpec(
                    num_scalar_prefetch=0,
                    grid=(grid_b,),
                    in_specs=in_specs,
                    out_specs=pl.BlockSpec((tm, out_p), lambda i: (i, 0)),
                    scratch_shapes=scratch_shapes,
                ),
                compiler_params=pltpu.CompilerParams(
                    dimension_semantics=("parallel",),      # batch tiles shard across TCs (v7x)
                    vmem_limit_bytes=hw["vmem_limit"],      # generation-specific budget
                ),
            )(*operands)
            _BUFFERED_WEIGHTS_OK = buffered
            return out_padded[:B, :Out]
        except Exception as e:   # e.g. pipeline_mode not supported by this JAX build
            last_err = e
    raise last_err


# ----------------------------------------------------------------------------
# Init / reference (pure JAX) for self-test
# ----------------------------------------------------------------------------
def init_mlp_params(key, input_features, hidden_features, output_features, layers):
    """Deterministic init mirroring the PyTorch module's layer shapes."""
    params = []
    dims = [(input_features, hidden_features)]
    dims += [(hidden_features, hidden_features) for _ in range(layers)]
    dims += [(hidden_features, output_features)]
    for (fan_in, fan_out) in dims:
        key, kw, kb = jax.random.split(key, 3)
        bound = 1.0 / jnp.sqrt(fan_in)
        w = jax.random.uniform(kw, (fan_in, fan_out), jnp.float32, -bound, bound)
        b = jax.random.uniform(kb, (1, fan_out), jnp.float32, -bound, bound)
        params.append((w, b))
    return params


def mlp_reference(x, params):
    x = jnp.maximum(x @ params[0][0] + params[0][1], 0.0)
    for (w, b) in params[1:-1]:
        x = jnp.maximum(x @ w + b, 0.0)
    return x @ params[-1][0] + params[-1][1]


if __name__ == "__main__":
    key = jax.random.PRNGKey(0)

    # ---- Config A: 2 hidden layers (unrolled, value-chained path), tiny batch ----
    input_features, hidden_features, output_features, layers = 16, 32, 8, 2
    batch = 8
    key, kx = jax.random.split(key)
    x = jax.random.normal(kx, (batch, input_features), jnp.float32)
    key, kp = jax.random.split(key)
    params = init_mlp_params(kp, input_features, hidden_features, output_features, layers)
    ref = mlp_reference(x, params)

    prepped_f32 = prepare_mlp_params(params, compute_dtype=jnp.float32)
    out = jax.block_until_ready(mlp_forward_fused(x, prepped_f32))
    assert out.shape == (batch, output_features)
    assert jnp.allclose(out, ref, atol=1e-5, rtol=1e-5)

    # bf16 MXU operands / bf16 resident activations (f32 accumulation) — perf path.
    prepped_bf16 = prepare_mlp_params(params, compute_dtype=jnp.bfloat16)
    out_bf16 = jax.block_until_ready(mlp_forward_fused(x, prepped_bf16))
    assert jnp.allclose(out_bf16, ref, atol=1e-1, rtol=1e-1)

    # ---- Config B: layers=0 (no hidden stack operands shipped at all) ----
    params_b = init_mlp_params(jax.random.PRNGKey(1), 16, 32, 8, 0)
    xb = jax.random.normal(jax.random.PRNGKey(2), (4, 16), jnp.float32)
    out_b = jax.block_until_ready(mlp_forward_fused(xb, prepare_mlp_params(params_b)))
    assert jnp.allclose(out_b, mlp_reference(xb, params_b), atol=1e-5, rtol=1e-5)

    # ---- Config C: 5 hidden layers (fori_loop path) + multi-tile batch grid ----
    params_c = init_mlp_params(jax.random.PRNGKey(3), 16, 32, 8, 5)
    xc = jax.random.normal(jax.random.PRNGKey(4), (600, 16), jnp.float32)
    out_c = jax.block_until_ready(mlp_forward_fused(xc, prepare_mlp_params(params_c)))
    assert out_c.shape == (600, 8)
    assert jnp.allclose(out_c, mlp_reference(xc, params_c), atol=2e-4, rtol=2e-4)

    print("KERNEL_OK")
</pallas_src>

<mosaic_0001>
module attributes {stable_mosaic.version = 11 : i64} {
  func.func @kernel(%arg0: i32, %arg1: memref<8x128xf32, #tpu.memory_space<vmem>>, %arg2: memref<128x128xf32, #tpu.memory_space<vmem>>, %arg3: memref<1x128xf32, #tpu.memory_space<vmem>>, %arg4: memref<2x128x128xf32, #tpu.memory_space<vmem>>, %arg5: memref<2x1x128xf32, #tpu.memory_space<vmem>>, %arg6: memref<128x128xf32, #tpu.memory_space<vmem>>, %arg7: memref<1x128xf32, #tpu.memory_space<vmem>>, %arg8: memref<8x128xf32, #tpu.memory_space<vmem>>) attributes {dimension_semantics = [#tpu.dimension_semantics<parallel>], iteration_bounds = array<i64: 1>, scalar_prefetch = 0 : i64, scratch_operands = 0 : i64, tpu.core_type = #tpu.core_type<tc>, window_params = [{transform_indices = @transform_0, window_bounds = array<i64: 8, 128>}, {pipeline_mode = #tpu.pipeline_mode<synchronous>, transform_indices = @transform_1, window_bounds = array<i64: 128, 128>}, {pipeline_mode = #tpu.pipeline_mode<synchronous>, transform_indices = @transform_2, window_bounds = array<i64: 1, 128>}, {pipeline_mode = #tpu.pipeline_mode<synchronous>, transform_indices = @transform_3, window_bounds = array<i64: 2, 128, 128>}, {pipeline_mode = #tpu.pipeline_mode<synchronous>, transform_indices = @transform_4, window_bounds = array<i64: 2, 1, 128>}, {pipeline_mode = #tpu.pipeline_mode<synchronous>, transform_indices = @transform_5, window_bounds = array<i64: 128, 128>}, {pipeline_mode = #tpu.pipeline_mode<synchronous>, transform_indices = @transform_6, window_bounds = array<i64: 1, 128>}, {transform_indices = @transform_7, window_bounds = array<i64: 8, 128>}]} {
    %c0 = arith.constant 0 : index
    %c0_0 = arith.constant 0 : index
    %0 = vector.load %arg1[%c0, %c0_0] : memref<8x128xf32, #tpu.memory_space<vmem>>, vector<8x128xf32>
    %c0_1 = arith.constant 0 : index
    %c0_2 = arith.constant 0 : index
    %1 = vector.load %arg2[%c0_1, %c0_2] : memref<128x128xf32, #tpu.memory_space<vmem>>, vector<128x128xf32>
    %cst = arith.constant dense<0.000000e+00> : vector<8x128xf32>
    %2 = tpu.matmul %0, %1, %cst {dimension_numbers = #tpu.dot_dimension_numbers<[1], [0], [0], [1], [0, 0, 1, 1], [], []>} : vector<8x128xf32>, vector<128x128xf32>, vector<8x128xf32> -> vector<8x128xf32>
    %c0_3 = arith.constant 0 : index
    %c0_4 = arith.constant 0 : index
    %3 = vector.load %arg3[%c0_3, %c0_4] : memref<1x128xf32, #tpu.memory_space<vmem>>, vector<1x128xf32>
    %4 = vector.broadcast %3 : vector<1x128xf32> to vector<8x128xf32>
    %5 = arith.addf %2, %4 : vector<8x128xf32>
    %cst_5 = arith.constant 0.000000e+00 : f32
    %6 = vector.broadcast %cst_5 : f32 to vector<8x128xf32>
    %7 = arith.maximumf %5, %6 : vector<8x128xf32>
    %c0_6 = arith.constant 0 : index
    %c0_7 = arith.constant 0 : index
    %c0_8 = arith.constant 0 : index
    %8 = vector.load %arg4[%c0_6, %c0_7, %c0_8] : memref<2x128x128xf32, #tpu.memory_space<vmem>>, vector<1x128x128xf32>
    %9 = vector.shape_cast %8 : vector<1x128x128xf32> to vector<128x128xf32>
    %cst_9 = arith.constant dense<0.000000e+00> : vector<8x128xf32>
    %10 = tpu.matmul %7, %9, %cst_9 {dimension_numbers = #tpu.dot_dimension_numbers<[1], [0], [0], [1], [0, 0, 1, 1], [], []>} : vector<8x128xf32>, vector<128x128xf32>, vector<8x128xf32> -> vector<8x128xf32>
    %c0_10 = arith.constant 0 : index
    %c0_11 = arith.constant 0 : index
    %c0_12 = arith.constant 0 : index
    %11 = vector.load %arg5[%c0_10, %c0_11, %c0_12] : memref<2x1x128xf32, #tpu.memory_space<vmem>>, vector<1x1x128xf32>
    %12 = vector.shape_cast %11 : vector<1x1x128xf32> to vector<1x128xf32>
    %13 = vector.broadcast %12 : vector<1x128xf32> to vector<8x128xf32>
    %14 = arith.addf %10, %13 : vector<8x128xf32>
    %cst_13 = arith.constant 0.000000e+00 : f32
    %15 = vector.broadcast %cst_13 : f32 to vector<8x128xf32>
    %16 = arith.maximumf %14, %15 : vector<8x128xf32>
    %c1 = arith.constant 1 : index
    %c0_14 = arith.constant 0 : index
    %c0_15 = arith.constant 0 : index
    %17 = vector.load %arg4[%c1, %c0_14, %c0_15] : memref<2x128x128xf32, #tpu.memory_space<vmem>>, vector<1x128x128xf32>
    %18 = vector.shape_cast %17 : vector<1x128x128xf32> to vector<128x128xf32>
    %cst_16 = arith.constant dense<0.000000e+00> : vector<8x128xf32>
    %19 = tpu.matmul %16, %18, %cst_16 {dimension_numbers = #tpu.dot_dimension_numbers<[1], [0], [0], [1], [0, 0, 1, 1], [], []>} : vector<8x128xf32>, vector<128x128xf32>, vector<8x128xf32> -> vector<8x128xf32>
    %c1_17 = arith.constant 1 : index
    %c0_18 = arith.constant 0 : index
    %c0_19 = arith.constant 0 : index
    %20 = vector.load %arg5[%c1_17, %c0_18, %c0_19] : memref<2x1x128xf32, #tpu.memory_space<vmem>>, vector<1x1x128xf32>
    %21 = vector.shape_cast %20 : vector<1x1x128xf32> to vector<1x128xf32>
    %22 = vector.broadcast %21 : vector<1x128xf32> to vector<8x128xf32>
    %23 = arith.addf %19, %22 : vector<8x128xf32>
    %cst_20 = arith.constant 0.000000e+00 : f32
    %24 = vector.broadcast %cst_20 : f32 to vector<8x128xf32>
    %25 = arith.maximumf %23, %24 : vector<8x128xf32>
    %c0_21 = arith.constant 0 : index
    %c0_22 = arith.constant 0 : index
    %26 = vector.load %arg6[%c0_21, %c0_22] : memref<128x128xf32, #tpu.memory_space<vmem>>, vector<128x128xf32>
    %cst_23 = arith.constant dense<0.000000e+00> : vector<8x128xf32>
    %27 = tpu.matmul %25, %26, %cst_23 {dimension_numbers = #tpu.dot_dimension_numbers<[1], [0], [0], [1], [0, 0, 1, 1], [], []>} : vector<8x128xf32>, vector<128x128xf32>, vector<8x128xf32> -> vector<8x128xf32>
    %c0_24 = arith.constant 0 : index
    %c0_25 = arith.constant 0 : index
    %28 = vector.load %arg7[%c0_24, %c0_25] : memref<1x128xf32, #tpu.memory_space<vmem>>, vector<1x128xf32>
    %29 = vector.broadcast %28 : vector<1x128xf32> to vector<8x128xf32>
    %30 = arith.addf %27, %29 : vector<8x128xf32>
    %c0_26 = arith.constant 0 : index
    %c0_27 = arith.constant 0 : index
    %31 = vector.load %arg8[%c0_26, %c0_27] : memref<8x128xf32, #tpu.memory_space<vmem>>, vector<8x128xf32>
    tpu.vector_store %arg8[%c0_26, %c0_27], %30 {strides = array<i32>} : memref<8x128xf32, #tpu.memory_space<vmem>>, vector<8x128xf32>,
    return
  }
  func.func @transform_0(%arg0: i32) -> (i32, i32) {
    %c0_i32 = arith.constant 0 : i32
    %c0_i32_0 = arith.constant 0 : i32
    return %arg0, %c0_i32 : i32, i32
  }
  func.func @transform_1(%arg0: i32) -> (i32, i32) {
    %c0_i32 = arith.constant 0 : i32
    %c0_i32_0 = arith.constant 0 : i32
    %c0_i32_1 = arith.constant 0 : i32
    return %c0_i32, %c0_i32_0 : i32, i32
  }
  func.func @transform_2(%arg0: i32) -> (i32, i32) {
    %c0_i32 = arith.constant 0 : i32
    %c0_i32_0 = arith.constant 0 : i32
    %c0_i32_1 = arith.constant 0 : i32
    return %c0_i32, %c0_i32_0 : i32, i32
  }
  func.func @transform_3(%arg0: i32) -> (i32, i32, i32) {
    %c0_i32 = arith.constant 0 : i32
    %c0_i32_0 = arith.constant 0 : i32
    %c0_i32_1 = arith.constant 0 : i32
    %c0_i32_2 = arith.constant 0 : i32
    return %c0_i32, %c0_i32_0, %c0_i32_1 : i32, i32, i32
  }
  func.func @transform_4(%arg0: i32) -> (i32, i32, i32) {
    %c0_i32 = arith.constant 0 : i32
    %c0_i32_0 = arith.constant 0 : i32
    %c0_i32_1 = arith.constant 0 : i32
    %c0_i32_2 = arith.constant 0 : i32
    return %c0_i32, %c0_i32_0, %c0_i32_1 : i32, i32, i32
  }
  func.func @transform_5(%arg0: i32) -> (i32, i32) {
    %c0_i32 = arith.constant 0 : i32
    %c0_i32_0 = arith.constant 0 : i32
    %c0_i32_1 = arith.constant 0 : i32
    return %c0_i32, %c0_i32_0 : i32, i32
  }
  func.func @transform_6(%arg0: i32) -> (i32, i32) {
    %c0_i32 = arith.constant 0 : i32
    %c0_i32_0 = arith.constant 0 : i32
    %c0_i32_1 = arith.constant 0 : i32
    return %c0_i32, %c0_i32_0 : i32, i32
  }
  func.func @transform_7(%arg0: i32) -> (i32, i32) {
    %c0_i32 = arith.constant 0 : i32
    %c0_i32_0 = arith.constant 0 : i32
    return %arg0, %c0_i32 : i32, i32
  }
}

module attributes {stable_mosaic.version = 11 : i64} {
  func.func @kernel(%arg0: i32, %arg1: memref<8x128xf32, #tpu.memory_space<vmem>>, %arg2: memref<128x128xf32, #tpu.memory_space<vmem>>, %arg3: memref<1x128xf32, #tpu.memory_space<vmem>>, %arg4: memref<2x128x128xf32, #tpu.memory_space<vmem>>, %arg5: memref<2x1x128xf32, #tpu.memory_space<vmem>>, %arg6: memref<128x128xf32, #tpu.memory_space<vmem>>, %arg7: memref<1x128xf32, #tpu.memory_space<vmem>>, %arg8: memref<8x128xf32, #tpu.memory_space<vmem>>) attributes {dimension_semantics = [#tpu.dimension_semantics<parallel>], iteration_bounds = array<i64: 1>, scalar_prefetch = 0 : i64, scratch_operands = 0 : i64, tpu.core_type = #tpu.core_type<tc>, window_params = [{transform_indices = @transform_0, window_bounds = array<i64: 8, 128>}, {pipeline_mode = #tpu.pipeline_mode<synchronous>, transform_indices = @transform_1, window_bounds = array<i64: 128, 128>}, {pipeline_mode = #tpu.pipeline_mode<synchronous>, transform_indices = @transform_2, window_bounds = array<i64: 1, 128>}, {pipeline_mode = #tpu.pipeline_mode<synchronous>, transform_indices = @transform_3, window_bounds = array<i64: 2, 128, 128>}, {pipeline_mode = #tpu.pipeline_mode<synchronous>, transform_indices = @transform_4, window_bounds = array<i64: 2, 1, 128>}, {pipeline_mode = #tpu.pipeline_mode<synchronous>, transform_indices = @transform_5, window_bounds = array<i64: 128, 128>}, {pipeline_mode = #tpu.pipeline_mode<synchronous>, transform_indices = @transform_6, window_bounds = array<i64: 1, 128>}, {transform_indices = @transform_7, window_bounds = array<i64: 8, 128>}]} {
    %c0 = arith.constant 0 : index
    %c0_0 = arith.constant 0 : index
    %0 = vector.load %arg1[%c0, %c0_0] : memref<8x128xf32, #tpu.memory_space<vmem>>, vector<8x128xf32>
    %c0_1 = arith.constant 0 : index
    %c0_2 = arith.constant 0 : index
    %1 = vector.load %arg2[%c0_1, %c0_2] : memref<128x128xf32, #tpu.memory_space<vmem>>, vector<128x128xf32>
    %cst = arith.constant dense<0.000000e+00> : vector<8x128xf32>
    %2 = tpu.matmul %0, %1, %cst {dimension_numbers = #tpu.dot_dimension_numbers<[1], [0], [0], [1], [0, 0, 1, 1], [], []>} : vector<8x128xf32>, vector<128x128xf32>, vector<8x128xf32> -> vector<8x128xf32>
    %c0_3 = arith.constant 0 : index
    %c0_4 = arith.constant 0 : index
    %3 = vector.load %arg3[%c0_3, %c0_4] : memref<1x128xf32, #tpu.memory_space<vmem>>, vector<1x128xf32>
    %4 = vector.broadcast %3 : vector<1x128xf32> to vector<8x128xf32>
    %5 = arith.addf %2, %4 : vector<8x128xf32>
    %cst_5 = arith.constant 0.000000e+00 : f32
    %6 = vector.broadcast %cst_5 : f32 to vector<8x128xf32>
    %7 = arith.maximumf %5, %6 : vector<8x128xf32>
    %c0_6 = arith.constant 0 : index
    %c0_7 = arith.constant 0 : index
    %c0_8 = arith.constant 0 : index
    %8 = vector.load %arg4[%c0_6, %c0_7, %c0_8] : memref<2x128x128xf32, #tpu.memory_space<vmem>>, vector<1x128x128xf32>
    %9 = vector.shape_cast %8 : vector<1x128x128xf32> to vector<128x128xf32>
    %cst_9 = arith.constant dense<0.000000e+00> : vector<8x128xf32>
    %10 = tpu.matmul %7, %9, %cst_9 {dimension_numbers = #tpu.dot_dimension_numbers<[1], [0], [0], [1], [0, 0, 1, 1], [], []>} : vector<8x128xf32>, vector<128x128xf32>, vector<8x128xf32> -> vector<8x128xf32>
    %c0_10 = arith.constant 0 : index
    %c0_11 = arith.constant 0 : index
    %c0_12 = arith.constant 0 : index
    %11 = vector.load %arg5[%c0_10, %c0_11, %c0_12] : memref<2x1x128xf32, #tpu.memory_space<vmem>>, vector<1x1x128xf32>
    %12 = vector.shape_cast %11 : vector<1x1x128xf32> to vector<1x128xf32>
    %13 = vector.broadcast %12 : vector<1x128xf32> to vector<8x128xf32>
    %14 = arith.addf %10, %13 : vector<8x128xf32>
    %cst_13 = arith.constant 0.000000e+00 : f32
    %15 = vector.broadcast %cst_13 : f32 to vector<8x128xf32>
    %16 = arith.maximumf %14, %15 : vector<8x128xf32>
    %c1 = arith.constant 1 : index
    %c0_14 = arith.constant 0 : index
    %c0_15 = arith.constant 0 : index
    %17 = vector.load %arg4[%c1, %c0_14, %c0_15] : memref<2x128x128xf32, #tpu.memory_space<vmem>>, vector<1x128x128xf32>
    %18 = vector.shape_cast %17 : vector<1x128x128xf32> to vector<128x128xf32>
    %cst_16 = arith.constant dense<0.000000e+00> : vector<8x128xf32>
    %19 = tpu.matmul %16, %18, %cst_16 {dimension_numbers = #tpu.dot_dimension_numbers<[1], [0], [0], [1], [0, 0, 1, 1], [], []>} : vector<8x128xf32>, vector<128x128xf32>, vector<8x128xf32> -> vector<8x128xf32>
    %c1_17 = arith.constant 1 : index
    %c0_18 = arith.constant 0 : index
    %c0_19 = arith.constant 0 : index
    %20 = vector.load %arg5[%c1_17, %c0_18, %c0_19] : memref<2x1x128xf32, #tpu.memory_space<vmem>>, vector<1x1x128xf32>
    %21 = vector.shape_cast %20 : vector<1x1x128xf32> to vector<1x128xf32>
    %22 = vector.broadcast %21 : vector<1x128xf32> to vector<8x128xf32>
    %23 = arith.addf %19, %22 : vector<8x128xf32>
    %cst_20 = arith.constant 0.000000e+00 : f32
    %24 = vector.broadcast %cst_20 : f32 to vector<8x128xf32>
    %25 = arith.maximumf %23, %24 : vector<8x128xf32>
    %c0_21 = arith.constant 0 : index
    %c0_22 = arith.constant 0 : index
    %26 = vector.load %arg6[%c0_21, %c0_22] : memref<128x128xf32, #tpu.memory_space<vmem>>, vector<128x128xf32>
    %cst_23 = arith.constant dense<0.000000e+00> : vector<8x128xf32>
    %27 = tpu.matmul %25, %26, %cst_23 {dimension_numbers = #tpu.dot_dimension_numbers<[1], [0], [0], [1], [0, 0, 1, 1], [], []>} : vector<8x128xf32>, vector<128x128xf32>, vector<8x128xf32> -> vector<8x128xf32>
    %c0_24 = arith.constant 0 : index
    %c0_25 = arith.constant 0 : index
    %28 = vector.load %arg7[%c0_24, %c0_25] : memref<1x128xf32, #tpu.memory_space<vmem>>, vector<1x128xf32>
    %29 = vector.broadcast %28 : vector<1x128xf32> to vector<8x128xf32>
    %30 = arith.addf %27, %29 : vector<8x128xf32>
    %c0_26 = arith.constant 0 : index
    %c0_27 = arith.constant 0 : index
    %31 = vector.load %arg8[%c0_26, %c0_27] : memref<8x128xf32, #tpu.memory_space<vmem>>, vector<8x128xf32>
    tpu.vector_store %arg8[%c0_26, %c0_27], %30 {strides = array<i32>} : memref<8x128xf32, #tpu.memory_space<vmem>>, vector<8x128xf32>,
    return
  }
  func.func @transform_0(%arg0: i32) -> (i32, i32) {
    %c0_i32 = arith.constant 0 : i32
    %c0_i32_0 = arith.constant 0 : i32
    return %arg0, %c0_i32 : i32, i32
  }
  func.func @transform_1(%arg0: i32) -> (i32, i32) {
    %c0_i32 = arith.constant 0 : i32
    %c0_i32_0 = arith.constant 0 : i32
    %c0_i32_1 = arith.constant 0 : i32
    return %c0_i32, %c0_i32_0 : i32, i32
  }
  func.func @transform_2(%arg0: i32) -> (i32, i32) {
    %c0_i32 = arith.constant 0 : i32
    %c0_i32_0 = arith.constant 0 : i32
    %c0_i32_1 = arith.constant 0 : i32
    return %c0_i32, %c0_i32_0 : i32, i32
  }
  func.func @transform_3(%arg0: i32) -> (i32, i32, i32) {
    %c0_i32 = arith.constant 0 : i32
    %c0_i32_0 = arith.constant 0 : i32
    %c0_i32_1 = arith.constant 0 : i32
    %c0_i32_2 = arith.constant 0 : i32
    return %c0_i32, %c0_i32_0, %c0_i32_1 : i32, i32, i32
  }
  func.func @transform_4(%arg0: i32) -> (i32, i32, i32) {
    %c0_i32 = arith.constant 0 : i32
    %c0_i32_0 = arith.constant 0 : i32
    %c0_i32_1 = arith.constant 0 : i32
    %c0_i32_2 = arith.constant 0 : i32
    return %c0_i32, %c0_i32_0, %c0_i32_1 : i32, i32, i32
  }
  func.func @transform_5(%arg0: i32) -> (i32, i32) {
    %c0_i32 = arith.constant 0 : i32
    %c0_i32_0 = arith.constant 0 : i32
    %c0_i32_1 = arith.constant 0 : i32
    return %c0_i32, %c0_i32_0 : i32, i32
  }
  func.func @transform_6(%arg0: i32) -> (i32, i32) {
    %c0_i32 = arith.constant 0 : i32
    %c0_i32_0 = arith.constant 0 : i32
    %c0_i32_1 = arith.constant 0 : i32
    return %c0_i32, %c0_i32_0 : i32, i32
  }
  func.func @transform_7(%arg0: i32) -> (i32, i32) {
    %c0_i32 = arith.constant 0 : i32
    %c0_i32_0 = arith.constant 0 : i32
    return %arg0, %c0_i32 : i32, i32
  }
}

</mosaic_0001>

<bundles_post_ra>
// kernel: tpu_custom_call.1
= control target key start
LH: loop header
LB: loop body
LE: loop exit
PB: predicated region body
PF: predicated region fallthrough
CT: control target
= control target key end

     0   :  { %12 = vsyncpa [#allocation3], 0  ;;  %s488_s0 = inlined_call_operand.hbm [shape: f32[8,128], index: 0, kind: input, shape index: {}]   ;;  %s489_s1 = inlined_call_operand.hbm [shape: f32[128,128], index: 1, kind: input, shape index: {}]   ;;  %s490_s2 = inlined_call_operand.vmem [shape: f32[1,128], index: 2, kind: input, shape index: {}]   ;;  %s491_s3 = inlined_call_operand.hbm [shape: f32[2,128,128], index: 3, kind: input, shape index: {}]   ;;  %s492_s4 = inlined_call_operand.vmem [shape: f32[2,1,128], index: 4, kind: input, shape index: {}]   ;;  %s493_s5 = inlined_call_operand.hbm [shape: f32[128,128], index: 5, kind: input, shape index: {}]   ;;  %s494_s6 = inlined_call_operand.vmem [shape: f32[1,128], index: 6, kind: input, shape index: {}]   ;;  %s495_s7 = inlined_call_operand.hbm [shape: f32[8,128], index: 7, kind: output, shape index: {}]  }
   0x1   :  { %13 = vsyncpa [#allocation6], 0 }
   0x2   :  { %14 = vsyncpa [#allocation9], 0  ;;  %s31_s26 = sshll.u32 %s489_s1, 4  ;;  %s32_s26 = int_to_ptr.hbm [resolvable:$true] %s31_s26 }
   0x3   :  { %15 = vsyncpa [#allocation4], 0  ;;  %s414_s27 = smov [#allocation5]   ;;  %s21_s8 = sshll.u32 %s488_s0, 4  ;;  %s22_s8 = int_to_ptr.hbm [resolvable:$true] %s21_s8 }
   0x4   :  { %s33_s28 = sshll.u32 %s414_s27, 4  ;;  %s415_s9 = smov 128   ;;  %s34_s28 = int_to_ptr.vmem [resolvable:$true] %s33_s28 }
   0x5   :  { %s416_s10 = smov 8   ;;  %s417_s11 = smov [#allocation2]  }
   0x6   :  { %39 = dma.hbm_to_vmem [thread:$0]  %s32_s26, 2048, %s34_s28, [#allocation6], %s415_s9, %s415_s9, %s416_s10  }
   0x7   :  { %s23_s12 = sshll.u32 %s417_s11, 4  ;;  %s46_s15 = sshll.u32 %s491_s3, 4  ;;  %s24_s12 = int_to_ptr.vmem [resolvable:$true] %s23_s12  ;;  %s47_s15 = int_to_ptr.hbm [resolvable:$true] %s46_s15 }
   0x8   :  { %26 = dma.hbm_to_vmem [thread:$0]  %s22_s8, 128, %s24_s12, [#allocation3]  }
   0x9   :  { %s61_s17 = sshll.u32 %s493_s5, 4  ;;  %s418_s18 = smov [#allocation7]   ;;  %s62_s17 = int_to_ptr.hbm [resolvable:$true] %s61_s17 }
   0xa   :  { %s48_s19 = sshll.u32 %s418_s18, 4  ;;  %s419_s0 = smov [#allocation8]   ;;  %s49_s19 = int_to_ptr.vmem [resolvable:$true] %s48_s19 }
   0xb   :  { %54 = dma.hbm_to_vmem [thread:$0]  %s47_s15, 4096, %s49_s19, [#allocation6], %s415_s9, %s415_s9, %s416_s10  }
   0xc   :  { %s63_s20 = sshll.u32 %s419_s0, 4  ;;  %s64_s20 = int_to_ptr.vmem [resolvable:$true] %s63_s20 }
   0xd   :  { %69 = dma.hbm_to_vmem [thread:$0]  %s62_s17, 2048, %s64_s20, [#allocation9], %s415_s9, %s415_s9, %s416_s10  }
   0xe   :  { %406 = dma.done.wait [#allocation3], 128  }
   0xf   :  { %407 = vsyncadd [#allocation3], 4294967168 }
  0x10   :  { %408 = dma.done.wait [#allocation6], 6144  }
  0x11   :  { %409 = vsyncadd [#allocation6], 4294961152 }
  0x12   :  { %410 = dma.done.wait [#allocation9], 2048  }
  0x13   :  { %411 = vsyncadd [#allocation9], 4294965248  ;;  %v104_v0 = vld [vmem:[#allocation5 + $0x78] sm:$0xff]  ;;  %v103_v1 = vld [vmem:[#allocation5 + $0x70] sm:$0xff]  ;;  %s420_s26 = smov [#allocation10]   ;;  %s262_s30 = sshll.u32 %s495_s7, 4  ;;  %s263_s30 = int_to_ptr.hbm [resolvable:$true] %s262_s30 }
  0x14   :  { %109 = vmatpush.msra.mxu0 %v104_v0  ;;  %v102_v2 = vld [vmem:[#allocation5 + $0x68] sm:$0xff]  ;;  %v101_v3 = vld [vmem:[#allocation5 + $0x60] sm:$0xff]  ;;  %v145_v4 = vld [vmem:[#allocation7 + $0x78] sm:$0xff]  ;;  %s260_s27 = sshll.u32 %s420_s26, 4  ;;  %s261_s27 = int_to_ptr.vmem [resolvable:$true] %s260_s27 }
  0x15   :  { %v100_v5 = vld [vmem:[#allocation5 + $0x58] sm:$0xff]  ;;  %150 = vmatpush.msra.mxu1 %v145_v4  ;;  %v144_v6 = vld [vmem:[#allocation7 + $0x70] sm:$0xff]  ;;  %v143_v7 = vld [vmem:[#allocation7 + $0x68] sm:$0xff] }
  0x16   :  { %110 = vmatpush.msra.mxu0 %v103_v1  ;;  %v99_v8 = vld [vmem:[#allocation5 + $0x50] sm:$0xff]  ;;  %v142_v9 = vld [vmem:[#allocation7 + $0x60] sm:$0xff]  ;;  %v98_v10 = vld [vmem:[#allocation5 + $0x48] sm:$0xff] }
  0x17   :  { %151 = vmatpush.msra.mxu1 %v144_v6  ;;  %v141_v11 = vld [vmem:[#allocation7 + $0x58] sm:$0xff]  ;;  %v97_v12 = vld [vmem:[#allocation5 + $0x40] sm:$0xff]  ;;  %v140_v13 = vld [vmem:[#allocation7 + $0x50] sm:$0xff] }
  0x18   :  { %111 = vmatpush.msra.mxu0 %v102_v2  ;;  %v96_v14 = vld [vmem:[#allocation5 + $0x38] sm:$0xff]  ;;  %v139_v15 = vld [vmem:[#allocation7 + $0x48] sm:$0xff]  ;;  %v95_v16 = vld [vmem:[#allocation5 + $0x30] sm:$0xff] }
  0x19   :  { %152 = vmatpush.msra.mxu1 %v143_v7  ;;  %v138_v17 = vld [vmem:[#allocation7 + $0x40] sm:$0xff]  ;;  %v94_v18 = vld [vmem:[#allocation5 + $0x28] sm:$0xff]  ;;  %v137_v19 = vld [vmem:[#allocation7 + $0x38] sm:$0xff] }
  0x1a   :  { %112 = vmatpush.msra.mxu0 %v101_v3  ;;  %v93_v20 = vld [vmem:[#allocation5 + $0x20] sm:$0xff]  ;;  %v136_v21 = vld [vmem:[#allocation7 + $0x30] sm:$0xff]  ;;  %v92_v22 = vld [vmem:[#allocation5 + $0x18] sm:$0xff] }
  0x1b   :  { %153 = vmatpush.msra.mxu1 %v142_v9  ;;  %v135_v23 = vld [vmem:[#allocation7 + $0x28] sm:$0xff]  ;;  %v91_v24 = vld [vmem:[#allocation5 + $0x10] sm:$0xff]  ;;  %v134_v25 = vld [vmem:[#allocation7 + $0x20] sm:$0xff] }
  0x1c   :  { %113 = vmatpush.msra.mxu0 %v100_v5  ;;  %v90_v26 = vld [vmem:[#allocation5 + $0x8] sm:$0xff]  ;;  %v133_v27 = vld [vmem:[#allocation7 + $0x18] sm:$0xff]  ;;  %v89_v28 = vld [vmem:[#allocation5] sm:$0xff] }
  0x1d   :  { %154 = vmatpush.msra.mxu1 %v141_v11  ;;  %v88_v29 = vld [vmem:[#allocation2] sm:$0xff]  ;;  %v132_v30 = vld [vmem:[#allocation7 + $0x10] sm:$0xff]  ;;  %v131_v31 = vld [vmem:[#allocation7 + $0x8] sm:$0xff] }
  0x1e   :  { %114 = vmatpush.msra.mxu0 %v99_v8  ;;  %v130_v32 = vld [vmem:[#allocation7] sm:$0xff]  ;;  %v187_v33 = vld [vmem:[#allocation7 + $0xf8] sm:$0xff]  ;;  %v186_v34 = vld [vmem:[#allocation7 + $0xf0] sm:$0xff] }
  0x1f   :  { %155 = vmatpush.msra.mxu1 %v140_v13  ;;  %193 = vmatpush.msra.mxu2 %v187_v33  ;;  %v185_v35 = vld [vmem:[#allocation7 + $0xe8] sm:$0xff]  ;;  %v184_v36 = vld [vmem:[#allocation7 + $0xe0] sm:$0xff]  ;;  %v183_v37 = vld [vmem:[#allocation7 + $0xd8] sm:$0xff] }
  0x20   :  { %115 = vmatpush.msra.mxu0 %v98_v10  ;;  %v182_v38 = vld [vmem:[#allocation7 + $0xd0] sm:$0xff]  ;;  %v181_v39 = vld [vmem:[#allocation7 + $0xc8] sm:$0xff]  ;;  %v180_v40 = vld [vmem:[#allocation7 + $0xc0] sm:$0xff] }
  0x21   :  { %156 = vmatpush.msra.mxu1 %v139_v15  ;;  %194 = vmatpush.msra.mxu2 %v186_v34  ;;  %v179_v41 = vld [vmem:[#allocation7 + $0xb8] sm:$0xff]  ;;  %v178_v42 = vld [vmem:[#allocation7 + $0xb0] sm:$0xff]  ;;  %v177_v43 = vld [vmem:[#allocation7 + $0xa8] sm:$0xff] }
  0x22   :  { %116 = vmatpush.msra.mxu0 %v97_v12  ;;  %v176_v44 = vld [vmem:[#allocation7 + $0xa0] sm:$0xff]  ;;  %v175_v45 = vld [vmem:[#allocation7 + $0x98] sm:$0xff]  ;;  %v174_v50 = vld [vmem:[#allocation7 + $0x90] sm:$0xff] }
  0x23   :  { %157 = vmatpush.msra.mxu1 %v138_v17  ;;  %195 = vmatpush.msra.mxu2 %v185_v35  ;;  %v282_v46 = vld [vmem:[%s490_s2] ss:$0 sm:$0xff]  ;;  %v173_v51 = vld [vmem:[#allocation7 + $0x88] sm:$0xff]  ;;  %v172_v52 = vld [vmem:[#allocation7 + $0x80] sm:$0xff] }
  0x24   :  { %117 = vmatpush.msra.mxu0 %v96_v14  ;;  %v229_v53 = vld [vmem:[#allocation8 + $0x78] sm:$0xff]  ;;  %v228_v54 = vld [vmem:[#allocation8 + $0x70] sm:$0xff]  ;;  %v227_v55 = vld [vmem:[#allocation8 + $0x68] sm:$0xff] }
  0x25   :  { %158 = vmatpush.msra.mxu1 %v137_v19  ;;  %196 = vmatpush.msra.mxu2 %v184_v36  ;;  %v226_v56 = vld [vmem:[#allocation8 + $0x60] sm:$0xff]  ;;  %v225_v57 = vld [vmem:[#allocation8 + $0x58] sm:$0xff]  ;;  %v224_v58 = vld [vmem:[#allocation8 + $0x50] sm:$0xff] }
  0x26   :  { %118 = vmatpush.msra.mxu0 %v95_v16  ;;  %234 = vmatpush.msra.mxu3 %v229_v53  ;;  %v223_v59 = vld [vmem:[#allocation8 + $0x48] sm:$0xff]  ;;  %v222_v60 = vld [vmem:[#allocation8 + $0x40] sm:$0xff]  ;;  %v221_v61 = vld [vmem:[#allocation8 + $0x38] sm:$0xff] }
  0x27   :  { %159 = vmatpush.msra.mxu1 %v136_v21  ;;  %197 = vmatpush.msra.mxu2 %v183_v37  ;;  %v220_v62 = vld [vmem:[#allocation8 + $0x30] sm:$0xff]  ;;  %v219_v63 = vld [vmem:[#allocation8 + $0x28] sm:$0xff]  ;;  %v218_v0 = vld [vmem:[#allocation8 + $0x20] sm:$0xff] }
  0x28   :  { %119 = vmatpush.msra.mxu0 %v94_v18  ;;  %235 = vmatpush.msra.mxu3 %v228_v54  ;;  %v217_v1 = vld [vmem:[#allocation8 + $0x18] sm:$0xff]  ;;  %v216_v6 = vld [vmem:[#allocation8 + $0x10] sm:$0xff]  ;;  %v215_v7 = vld [vmem:[#allocation8 + $0x8] sm:$0xff] }
  0x29   :  { %160 = vmatpush.msra.mxu1 %v135_v23  ;;  %198 = vmatpush.msra.mxu2 %v182_v38  ;;  %v283_v2 = vld [vmem:[%s492_s4] ss:$0 sm:$0xff]  ;;  %v214_v8 = vld [vmem:[#allocation8] sm:$0xff]  ;;  %v284_v9 = vld [vmem:[%s492_s4 + $0x1] ss:$0 sm:$0xff] }
  0x2a   :  { %120 = vmatpush.msra.mxu0 %v93_v20  ;;  %236 = vmatpush.msra.mxu3 %v227_v55  ;;  %v285_v13 = vld [vmem:[%s494_s6] ss:$0 sm:$0xff] }
  0x2b   :  { %161 = vmatpush.msra.mxu1 %v134_v25  ;;  %199 = vmatpush.msra.mxu2 %v181_v39 }
  0x2c   :  { %121 = vmatpush.msra.mxu0 %v92_v22  ;;  %237 = vmatpush.msra.mxu3 %v226_v56 }
  0x2d   :  { %162 = vmatpush.msra.mxu1 %v133_v27  ;;  %200 = vmatpush.msra.mxu2 %v180_v40 }
  0x2e   :  { %122 = vmatpush.msra.mxu0 %v91_v24  ;;  %238 = vmatpush.msra.mxu3 %v225_v57 }
  0x2f   :  { %163 = vmatpush.msra.mxu1 %v132_v30  ;;  %201 = vmatpush.msra.mxu2 %v179_v41 }
  0x30   :  { %123 = vmatpush.msra.mxu0 %v90_v26  ;;  %239 = vmatpush.msra.mxu3 %v224_v58 }
  0x31   :  { %164 = vmatpush.msra.mxu1 %v131_v31  ;;  %202 = vmatpush.msra.mxu2 %v178_v42 }
  0x32   :  { %124 = vmatpush.msra.mxu0 %v89_v28  ;;  %240 = vmatpush.msra.mxu3 %v223_v59 }
  0x33   :  { %125 = vmatmul.f32.vlgmr.msra.gmra.mxu0 %v88_v29  ;;  %165 = vmatpush.msra.mxu1 %v130_v32 }
  0x34   :  { %203 = vmatpush.msra.mxu2 %v177_v43  ;;  %241 = vmatpush.msra.mxu3 %v222_v60 }
  0x36   :  { %204 = vmatpush.msra.mxu2 %v176_v44  ;;  %242 = vmatpush.msra.mxu3 %v221_v61 }
  0x38   :  { %205 = vmatpush.msra.mxu2 %v175_v45  ;;  %243 = vmatpush.msra.mxu3 %v220_v62 }
  0x3a   :  { %206 = vmatpush.msra.mxu2 %v174_v50  ;;  %244 = vmatpush.msra.mxu3 %v219_v63 }
  0x3c   :  { %207 = vmatpush.msra.mxu2 %v173_v51  ;;  %245 = vmatpush.msra.mxu3 %v218_v0 }
  0x3e   :  { %208 = vmatpush.msra.mxu2 %v172_v52  ;;  %246 = vmatpush.msra.mxu3 %v217_v1 }
  0x40   :  { %247 = vmatpush.msra.mxu3 %v216_v6 }
  0x42   :  { %248 = vmatpush.msra.mxu3 %v215_v7 }
  0x44   :  { %249 = vmatpush.msra.mxu3 %v214_v8 }
  0xb0   :  { %v126_v47 = vpop.f32.mrf.mxu0 }
  0xb1   :  { %v127_v48 = vadd.f32 %v282_v46, %v126_v47 }
  0xb3   :  { %v129_v49 = vmax.f32 %v127_v48, 0.0 }
  0xb5   :  { %166 = vmatmul.f32.vlgmr.msra.gmra.mxu1 %v129_v49 }
 0x132   :  { %v167_v3 = vpop.f32.mrf.mxu1 }
 0x133   :  { %v168_v4 = vadd.f32 %v283_v2, %v167_v3 }
 0x135   :  { %v170_v5 = vmax.f32 %v168_v4, 0.0 }
 0x137   :  { %209 = vmatmul.f32.vlgmr.msra.gmra.mxu2 %v170_v5 }
 0x1ba   :  { %v210_v10 = vpop.f32.mrf.mxu2 }
 0x1bb   :  { %v211_v11 = vadd.f32 %v284_v9, %v210_v10 }
 0x1bd   :  { %v213_v12 = vmax.f32 %v211_v11, 0.0 }
 0x1bf   :  { %250 = vmatmul.f32.vlgmr.msra.gmra.mxu3 %v213_v12 }
 0x242   :  { %v251_v14 = vpop.f32.mrf.mxu3 }
 0x243   :  { %v252_v15 = vadd.f32 %v285_v13, %v251_v14 }
 0x245   :  { %254 = vst [vmem:[#allocation10] sm:$0xff] %v252_v15 }
 0x246   :  { %265 = dma.vmem_to_hbm [thread:$0]  %s261_s27, 128, %s263_s30, [#allocation4]  }
 0x247   :  { %412 = dma.done.wait [#allocation4], 128  }
 0x248   :  { %413 = vsyncadd [#allocation4], 4294967168 }
 0x249   :  { %270 = vsyncpa [#allocation3], 1 }
 0x24a   :  { %271 = vsyncpa [#allocation6], 1 }
 0x24b   :  { %272 = vsyncpa [#allocation9], 1 }
 0x24c   :  { %273 = vsyncpa [#allocation4], 1 }

// kernel: tpu_custom_call.1
= control target key start
LH: loop header
LB: loop body
LE: loop exit
PB: predicated region body
PF: predicated region fallthrough
CT: control target
= control target key end

     0   :  { %12 = vsyncpa [#allocation3], 0  ;;  %s488_s0 = inlined_call_operand.hbm [shape: f32[8,128], index: 0, kind: input, shape index: {}]   ;;  %s489_s1 = inlined_call_operand.hbm [shape: f32[128,128], index: 1, kind: input, shape index: {}]   ;;  %s490_s2 = inlined_call_operand.vmem [shape: f32[1,128], index: 2, kind: input, shape index: {}]   ;;  %s491_s3 = inlined_call_operand.hbm [shape: f32[2,128,128], index: 3, kind: input, shape index: {}]   ;;  %s492_s4 = inlined_call_operand.vmem [shape: f32[2,1,128], index: 4, kind: input, shape index: {}]   ;;  %s493_s5 = inlined_call_operand.hbm [shape: f32[128,128], index: 5, kind: input, shape index: {}]   ;;  %s494_s6 = inlined_call_operand.vmem [shape: f32[1,128], index: 6, kind: input, shape index: {}]   ;;  %s495_s7 = inlined_call_operand.hbm [shape: f32[8,128], index: 7, kind: output, shape index: {}]  }
   0x1   :  { %13 = vsyncpa [#allocation6], 0 }
   0x2   :  { %14 = vsyncpa [#allocation9], 0  ;;  %s31_s26 = sshll.u32 %s489_s1, 4  ;;  %s32_s26 = int_to_ptr.hbm [resolvable:$true] %s31_s26 }
   0x3   :  { %15 = vsyncpa [#allocation4], 0  ;;  %s414_s27 = smov [#allocation5]   ;;  %s21_s8 = sshll.u32 %s488_s0, 4  ;;  %s22_s8 = int_to_ptr.hbm [resolvable:$true] %s21_s8 }
   0x4   :  { %s33_s28 = sshll.u32 %s414_s27, 4  ;;  %s415_s9 = smov 128   ;;  %s34_s28 = int_to_ptr.vmem [resolvable:$true] %s33_s28 }
   0x5   :  { %s416_s10 = smov 8   ;;  %s417_s11 = smov [#allocation2]  }
   0x6   :  { %39 = dma.hbm_to_vmem [thread:$0]  %s32_s26, 2048, %s34_s28, [#allocation6], %s415_s9, %s415_s9, %s416_s10  }
   0x7   :  { %s23_s12 = sshll.u32 %s417_s11, 4  ;;  %s46_s15 = sshll.u32 %s491_s3, 4  ;;  %s24_s12 = int_to_ptr.vmem [resolvable:$true] %s23_s12  ;;  %s47_s15 = int_to_ptr.hbm [resolvable:$true] %s46_s15 }
   0x8   :  { %26 = dma.hbm_to_vmem [thread:$0]  %s22_s8, 128, %s24_s12, [#allocation3]  }
   0x9   :  { %s61_s17 = sshll.u32 %s493_s5, 4  ;;  %s418_s18 = smov [#allocation7]   ;;  %s62_s17 = int_to_ptr.hbm [resolvable:$true] %s61_s17 }
   0xa   :  { %s48_s19 = sshll.u32 %s418_s18, 4  ;;  %s419_s0 = smov [#allocation8]   ;;  %s49_s19 = int_to_ptr.vmem [resolvable:$true] %s48_s19 }
   0xb   :  { %54 = dma.hbm_to_vmem [thread:$0]  %s47_s15, 4096, %s49_s19, [#allocation6], %s415_s9, %s415_s9, %s416_s10  }
   0xc   :  { %s63_s20 = sshll.u32 %s419_s0, 4  ;;  %s64_s20 = int_to_ptr.vmem [resolvable:$true] %s63_s20 }
   0xd   :  { %69 = dma.hbm_to_vmem [thread:$0]  %s62_s17, 2048, %s64_s20, [#allocation9], %s415_s9, %s415_s9, %s416_s10  }
   0xe   :  { %406 = dma.done.wait [#allocation3], 128  }
   0xf   :  { %407 = vsyncadd [#allocation3], 4294967168 }
  0x10   :  { %408 = dma.done.wait [#allocation6], 6144  }
  0x11   :  { %409 = vsyncadd [#allocation6], 4294961152 }
  0x12   :  { %410 = dma.done.wait [#allocation9], 2048  }
  0x13   :  { %411 = vsyncadd [#allocation9], 4294965248  ;;  %v104_v0 = vld [vmem:[#allocation5 + $0x78] sm:$0xff]  ;;  %v103_v1 = vld [vmem:[#allocation5 + $0x70] sm:$0xff]  ;;  %s420_s26 = smov [#allocation10]   ;;  %s262_s30 = sshll.u32 %s495_s7, 4  ;;  %s263_s30 = int_to_ptr.hbm [resolvable:$true] %s262_s30 }
  0x14   :  { %109 = vmatpush.msra.mxu0 %v104_v0  ;;  %v102_v2 = vld [vmem:[#allocation5 + $0x68] sm:$0xff]  ;;  %v101_v3 = vld [vmem:[#allocation5 + $0x60] sm:$0xff]  ;;  %v145_v4 = vld [vmem:[#allocation7 + $0x78] sm:$0xff]  ;;  %s260_s27 = sshll.u32 %s420_s26, 4  ;;  %s261_s27 = int_to_ptr.vmem [resolvable:$true] %s260_s27 }
  0x15   :  { %v100_v5 = vld [vmem:[#allocation5 + $0x58] sm:$0xff]  ;;  %150 = vmatpush.msra.mxu1 %v145_v4  ;;  %v144_v6 = vld [vmem:[#allocation7 + $0x70] sm:$0xff]  ;;  %v143_v7 = vld [vmem:[#allocation7 + $0x68] sm:$0xff] }
  0x16   :  { %110 = vmatpush.msra.mxu0 %v103_v1  ;;  %v99_v8 = vld [vmem:[#allocation5 + $0x50] sm:$0xff]  ;;  %v142_v9 = vld [vmem:[#allocation7 + $0x60] sm:$0xff]  ;;  %v98_v10 = vld [vmem:[#allocation5 + $0x48] sm:$0xff] }
  0x17   :  { %151 = vmatpush.msra.mxu1 %v144_v6  ;;  %v141_v11 = vld [vmem:[#allocation7 + $0x58] sm:$0xff]  ;;  %v97_v12 = vld [vmem:[#allocation5 + $0x40] sm:$0xff]  ;;  %v140_v13 = vld [vmem:[#allocation7 + $0x50] sm:$0xff] }
  0x18   :  { %111 = vmatpush.msra.mxu0 %v102_v2  ;;  %v96_v14 = vld [vmem:[#allocation5 + $0x38] sm:$0xff]  ;;  %v139_v15 = vld [vmem:[#allocation7 + $0x48] sm:$0xff]  ;;  %v95_v16 = vld [vmem:[#allocation5 + $0x30] sm:$0xff] }
  0x19   :  { %152 = vmatpush.msra.mxu1 %v143_v7  ;;  %v138_v17 = vld [vmem:[#allocation7 + $0x40] sm:$0xff]  ;;  %v94_v18 = vld [vmem:[#allocation5 + $0x28] sm:$0xff]  ;;  %v137_v19 = vld [vmem:[#allocation7 + $0x38] sm:$0xff] }
  0x1a   :  { %112 = vmatpush.msra.mxu0 %v101_v3  ;;  %v93_v20 = vld [vmem:[#allocation5 + $0x20] sm:$0xff]  ;;  %v136_v21 = vld [vmem:[#allocation7 + $0x30] sm:$0xff]  ;;  %v92_v22 = vld [vmem:[#allocation5 + $0x18] sm:$0xff] }
  0x1b   :  { %153 = vmatpush.msra.mxu1 %v142_v9  ;;  %v135_v23 = vld [vmem:[#allocation7 + $0x28] sm:$0xff]  ;;  %v91_v24 = vld [vmem:[#allocation5 + $0x10] sm:$0xff]  ;;  %v134_v25 = vld [vmem:[#allocation7 + $0x20] sm:$0xff] }
  0x1c   :  { %113 = vmatpush.msra.mxu0 %v100_v5  ;;  %v90_v26 = vld [vmem:[#allocation5 + $0x8] sm:$0xff]  ;;  %v133_v27 = vld [vmem:[#allocation7 + $0x18] sm:$0xff]  ;;  %v89_v28 = vld [vmem:[#allocation5] sm:$0xff] }
  0x1d   :  { %154 = vmatpush.msra.mxu1 %v141_v11  ;;  %v88_v29 = vld [vmem:[#allocation2] sm:$0xff]  ;;  %v132_v30 = vld [vmem:[#allocation7 + $0x10] sm:$0xff]  ;;  %v131_v31 = vld [vmem:[#allocation7 + $0x8] sm:$0xff] }
  0x1e   :  { %114 = vmatpush.msra.mxu0 %v99_v8  ;;  %v130_v32 = vld [vmem:[#allocation7] sm:$0xff]  ;;  %v187_v33 = vld [vmem:[#allocation7 + $0xf8] sm:$0xff]  ;;  %v186_v34 = vld [vmem:[#allocation7 + $0xf0] sm:$0xff] }
  0x1f   :  { %155 = vmatpush.msra.mxu1 %v140_v13  ;;  %193 = vmatpush.msra.mxu2 %v187_v33  ;;  %v185_v35 = vld [vmem:[#allocation7 + $0xe8] sm:$0xff]  ;;  %v184_v36 = vld [vmem:[#allocation7 + $0xe0] sm:$0xff]  ;;  %v183_v37 = vld [vmem:[#allocation7 + $0xd8] sm:$0xff] }
  0x20   :  { %115 = vmatpush.msra.mxu0 %v98_v10  ;;  %v182_v38 = vld [vmem:[#allocation7 + $0xd0] sm:$0xff]  ;;  %v181_v39 = vld [vmem:[#allocation7 + $0xc8] sm:$0xff]  ;;  %v180_v40 = vld [vmem:[#allocation7 + $0xc0] sm:$0xff] }
  0x21   :  { %156 = vmatpush.msra.mxu1 %v139_v15  ;;  %194 = vmatpush.msra.mxu2 %v186_v34  ;;  %v179_v41 = vld [vmem:[#allocation7 + $0xb8] sm:$0xff]  ;;  %v178_v42 = vld [vmem:[#allocation7 + $0xb0] sm:$0xff]  ;;  %v177_v43 = vld [vmem:[#allocation7 + $0xa8] sm:$0xff] }
  0x22   :  { %116 = vmatpush.msra.mxu0 %v97_v12  ;;  %v176_v44 = vld [vmem:[#allocation7 + $0xa0] sm:$0xff]  ;;  %v175_v45 = vld [vmem:[#allocation7 + $0x98] sm:$0xff]  ;;  %v174_v50 = vld [vmem:[#allocation7 + $0x90] sm:$0xff] }
  0x23   :  { %157 = vmatpush.msra.mxu1 %v138_v17  ;;  %195 = vmatpush.msra.mxu2 %v185_v35  ;;  %v282_v46 = vld [vmem:[%s490_s2] ss:$0 sm:$0xff]  ;;  %v173_v51 = vld [vmem:[#allocation7 + $0x88] sm:$0xff]  ;;  %v172_v52 = vld [vmem:[#allocation7 + $0x80] sm:$0xff] }
  0x24   :  { %117 = vmatpush.msra.mxu0 %v96_v14  ;;  %v229_v53 = vld [vmem:[#allocation8 + $0x78] sm:$0xff]  ;;  %v228_v54 = vld [vmem:[#allocation8 + $0x70] sm:$0xff]  ;;  %v227_v55 = vld [vmem:[#allocation8 + $0x68] sm:$0xff] }
  0x25   :  { %158 = vmatpush.msra.mxu1 %v137_v19  ;;  %196 = vmatpush.msra.mxu2 %v184_v36  ;;  %v226_v56 = vld [vmem:[#allocation8 + $0x60] sm:$0xff]  ;;  %v225_v57 = vld [vmem:[#allocation8 + $0x58] sm:$0xff]  ;;  %v224_v58 = vld [vmem:[#allocation8 + $0x50] sm:$0xff] }
  0x26   :  { %118 = vmatpush.msra.mxu0 %v95_v16  ;;  %234 = vmatpush.msra.mxu3 %v229_v53  ;;  %v223_v59 = vld [vmem:[#allocation8 + $0x48] sm:$0xff]  ;;  %v222_v60 = vld [vmem:[#allocation8 + $0x40] sm:$0xff]  ;;  %v221_v61 = vld [vmem:[#allocation8 + $0x38] sm:$0xff] }
  0x27   :  { %159 = vmatpush.msra.mxu1 %v136_v21  ;;  %197 = vmatpush.msra.mxu2 %v183_v37  ;;  %v220_v62 = vld [vmem:[#allocation8 + $0x30] sm:$0xff]  ;;  %v219_v63 = vld [vmem:[#allocation8 + $0x28] sm:$0xff]  ;;  %v218_v0 = vld [vmem:[#allocation8 + $0x20] sm:$0xff] }
  0x28   :  { %119 = vmatpush.msra.mxu0 %v94_v18  ;;  %235 = vmatpush.msra.mxu3 %v228_v54  ;;  %v217_v1 = vld [vmem:[#allocation8 + $0x18] sm:$0xff]  ;;  %v216_v6 = vld [vmem:[#allocation8 + $0x10] sm:$0xff]  ;;  %v215_v7 = vld [vmem:[#allocation8 + $0x8] sm:$0xff] }
  0x29   :  { %160 = vmatpush.msra.mxu1 %v135_v23  ;;  %198 = vmatpush.msra.mxu2 %v182_v38  ;;  %v283_v2 = vld [vmem:[%s492_s4] ss:$0 sm:$0xff]  ;;  %v214_v8 = vld [vmem:[#allocation8] sm:$0xff]  ;;  %v284_v9 = vld [vmem:[%s492_s4 + $0x1] ss:$0 sm:$0xff] }
  0x2a   :  { %120 = vmatpush.msra.mxu0 %v93_v20  ;;  %236 = vmatpush.msra.mxu3 %v227_v55  ;;  %v285_v13 = vld [vmem:[%s494_s6] ss:$0 sm:$0xff] }
  0x2b   :  { %161 = vmatpush.msra.mxu1 %v134_v25  ;;  %199 = vmatpush.msra.mxu2 %v181_v39 }
  0x2c   :  { %121 = vmatpush.msra.mxu0 %v92_v22  ;;  %237 = vmatpush.msra.mxu3 %v226_v56 }
  0x2d   :  { %162 = vmatpush.msra.mxu1 %v133_v27  ;;  %200 = vmatpush.msra.mxu2 %v180_v40 }
  0x2e   :  { %122 = vmatpush.msra.mxu0 %v91_v24  ;;  %238 = vmatpush.msra.mxu3 %v225_v57 }
  0x2f   :  { %163 = vmatpush.msra.mxu1 %v132_v30  ;;  %201 = vmatpush.msra.mxu2 %v179_v41 }
  0x30   :  { %123 = vmatpush.msra.mxu0 %v90_v26  ;;  %239 = vmatpush.msra.mxu3 %v224_v58 }
  0x31   :  { %164 = vmatpush.msra.mxu1 %v131_v31  ;;  %202 = vmatpush.msra.mxu2 %v178_v42 }
  0x32   :  { %124 = vmatpush.msra.mxu0 %v89_v28  ;;  %240 = vmatpush.msra.mxu3 %v223_v59 }
  0x33   :  { %125 = vmatmul.f32.vlgmr.msra.gmra.mxu0 %v88_v29  ;;  %165 = vmatpush.msra.mxu1 %v130_v32 }
  0x34   :  { %203 = vmatpush.msra.mxu2 %v177_v43  ;;  %241 = vmatpush.msra.mxu3 %v222_v60 }
  0x36   :  { %204 = vmatpush.msra.mxu2 %v176_v44  ;;  %242 = vmatpush.msra.mxu3 %v221_v61 }
  0x38   :  { %205 = vmatpush.msra.mxu2 %v175_v45  ;;  %243 = vmatpush.msra.mxu3 %v220_v62 }
  0x3a   :  { %206 = vmatpush.msra.mxu2 %v174_v50  ;;  %244 = vmatpush.msra.mxu3 %v219_v63 }
  0x3c   :  { %207 = vmatpush.msra.mxu2 %v173_v51  ;;  %245 = vmatpush.msra.mxu3 %v218_v0 }
  0x3e   :  { %208 = vmatpush.msra.mxu2 %v172_v52  ;;  %246 = vmatpush.msra.mxu3 %v217_v1 }
  0x40   :  { %247 = vmatpush.msra.mxu3 %v216_v6 }
  0x42   :  { %248 = vmatpush.msra.mxu3 %v215_v7 }
  0x44   :  { %249 = vmatpush.msra.mxu3 %v214_v8 }
  0xb0   :  { %v126_v47 = vpop.f32.mrf.mxu0 }
  0xb1   :  { %v127_v48 = vadd.f32 %v282_v46, %v126_v47 }
  0xb3   :  { %v129_v49 = vmax.f32 %v127_v48, 0.0 }
  0xb5   :  { %166 = vmatmul.f32.vlgmr.msra.gmra.mxu1 %v129_v49 }
 0x132   :  { %v167_v3 = vpop.f32.mrf.mxu1 }
 0x133   :  { %v168_v4 = vadd.f32 %v283_v2, %v167_v3 }
 0x135   :  { %v170_v5 = vmax.f32 %v168_v4, 0.0 }
 0x137   :  { %209 = vmatmul.f32.vlgmr.msra.gmra.mxu2 %v170_v5 }
 0x1ba   :  { %v210_v10 = vpop.f32.mrf.mxu2 }
 0x1bb   :  { %v211_v11 = vadd.f32 %v284_v9, %v210_v10 }
 0x1bd   :  { %v213_v12 = vmax.f32 %v211_v11, 0.0 }
 0x1bf   :  { %250 = vmatmul.f32.vlgmr.msra.gmra.mxu3 %v213_v12 }
 0x242   :  { %v251_v14 = vpop.f32.mrf.mxu3 }
 0x243   :  { %v252_v15 = vadd.f32 %v285_v13, %v251_v14 }
 0x245   :  { %254 = vst [vmem:[#allocation10] sm:$0xff] %v252_v15 }
 0x246   :  { %265 = dma.vmem_to_hbm [thread:$0]  %s261_s27, 128, %s263_s30, [#allocation4]  }
 0x247   :  { %412 = dma.done.wait [#allocation4], 128  }
 0x248   :  { %413 = vsyncadd [#allocation4], 4294967168 }
 0x249   :  { %270 = vsyncpa [#allocation3], 1 }
 0x24a   :  { %271 = vsyncpa [#allocation6], 1 }
 0x24b   :  { %272 = vsyncpa [#allocation9], 1 }
 0x24c   :  { %273 = vsyncpa [#allocation4], 1 }

</bundles_post_ra>
